<compile_context>
chip_gen: v7x
topology: tpu7x:2x2x1
jax: 0.10.0
libtpu: 0.0.40
codegen_flags: <defaults>
</compile_context>

<pallas_src>
import functools

import jax
import jax.numpy as jnp
from jax.experimental import pallas as pl
from jax.experimental.pallas import tpu as pltpu


def _round_up(v: int, m: int) -> int:
    return ((v + m - 1) // m) * m


# ------------------------------- kernels -------------------------------------

def _make_gcn_kernel(*, resident_feat: bool, apply_w: bool, tk: int):
    """Builds the tiled aggregation kernel.

    acc += adj_tile @ feat_tile over the reduction axis k; at the last k either
    out = acc @ W (aggregate-first) or out = acc (transform-first).
    """

    def kernel(adj_ref, feat_ref, *rest):
        if apply_w:
            w_ref, out_ref, acc_ref = rest
        else:
            out_ref, acc_ref = rest

        k = pl.program_id(1)

        @pl.when(k == 0)
        def _init():
            acc_ref[...] = jnp.zeros_like(acc_ref)

        if resident_feat:
            # feat is fully VMEM-resident; slice the current reduction chunk.
            off = pl.multiple_of(k * tk, tk)
            feat_tile = feat_ref[pl.ds(off, tk), :]
        else:
            feat_tile = feat_ref[...]

        acc_ref[...] += jnp.dot(adj_ref[...], feat_tile,
                                preferred_element_type=jnp.float32)

        @pl.when(k == pl.num_programs(1) - 1)
        def _finalize():
            if apply_w:
                out_ref[...] = jnp.dot(
                    acc_ref[...].astype(jnp.bfloat16), w_ref[...],
                    preferred_element_type=jnp.float32,
                ).astype(out_ref.dtype)
            else:
                out_ref[...] = acc_ref[...].astype(out_ref.dtype)

    return kernel


# ------------------------------- wrapper --------------------------------------

@functools.partial(
    jax.jit, static_argnames=("tm", "tk", "resident_budget_bytes"))
def gcn_layer_forward(x, edge_index, weight, *, tm=512, tk=1024,
                      resident_budget_bytes=24 * 1024 * 1024):
    """x: [N, F_in] f32, edge_index: [2, E] int32, weight: [F_in, F_out] -> [N, F_out] f32."""
    num_nodes = x.shape[0]
    f_in, f_out = weight.shape

    # ---- glue: self loops, D^-1/2 normalization ----
    loop_index = jnp.arange(num_nodes, dtype=edge_index.dtype)
    ei = jnp.concatenate([edge_index, jnp.stack([loop_index, loop_index])], axis=1)
    row, col = ei[0], ei[1]

    deg = jnp.zeros((num_nodes,), jnp.float32).at[row].add(1.0)
    # self loops guarantee deg >= 1; maximum() keeps rsqrt finite
    deg_inv_sqrt = jnp.where(deg > 0.0, jax.lax.rsqrt(jnp.maximum(deg, 1.0)), 0.0)
    norm = deg_inv_sqrt[row] * deg_inv_sqrt[col]

    # ---- matmul order: hot loop is always adj @ feat, feat width = min(F_in, F_out)
    aggregate_first = f_in <= f_out
    if aggregate_first:
        feat = x.astype(jnp.float32)
        feat_dim = f_in
    else:
        # fold the (cheap) feature transform first; hot loop is adj @ (x @ W)
        feat = jnp.dot(x.astype(jnp.float32), weight.astype(jnp.float32))
        feat_dim = f_out

    # ---- tile sizes (static) ----
    # Cap tm so the row-tile axis has >= 2 tiles when possible (v7x megacore);
    # no-op on single-TC v5e/v6e.
    tm = min(tm, max(128, _round_up(-(-num_nodes // 2), 128)))
    tk = min(tk, _round_up(num_nodes, 128))

    # Independent row/col padding (no lcm blow-up for asymmetric tiles).
    n_rows_pad = _round_up(num_nodes, tm)
    n_cols_pad = _round_up(num_nodes, tk)
    feat_pad = _round_up(feat_dim, 128)
    out_pad = _round_up(f_out, 128)
    out_cols = out_pad if aggregate_first else feat_pad

    # ---- normalized adjacency, scattered directly in bf16 (single N^2 pass) ----
    # Note: duplicate edges accumulate in bf16 (rounds vs the f32 reference).
    adj_bf16 = jnp.zeros((n_rows_pad, n_cols_pad), jnp.bfloat16).at[row, col].add(
        norm.astype(jnp.bfloat16))

    feat_p = jnp.zeros((n_cols_pad, feat_pad), jnp.bfloat16).at[
        :num_nodes, :feat_dim].set(feat.astype(jnp.bfloat16))

    # ---- VMEM-residency gate for the feature operand (conservative: 2 buffers) ----
    est_vmem = (
        2 * n_cols_pad * feat_pad * 2            # resident feat (double-buffer acct)
        + 2 * tm * tk * 2                        # adj tiles
        + 2 * tm * out_cols * 4                  # out tiles
        + (2 * feat_pad * out_pad * 2 if aggregate_first else 0)  # resident bf16 W
        + tm * feat_pad * 4                      # f32 accumulator scratch
    )
    resident_feat = est_vmem <= resident_budget_bytes

    grid = (n_rows_pad // tm, n_cols_pad // tk)
    compiler_params = pltpu.CompilerParams(
        dimension_semantics=("parallel", "arbitrary"),
        vmem_limit_bytes=48 * 1024 * 1024,
    )

    if resident_feat:
        # Whole feature matrix stays in VMEM; never re-streamed per row tile.
        feat_spec = pl.BlockSpec((n_cols_pad, feat_pad), lambda i, k: (0, 0))
    else:
        # Streamed fallback (large tm amortises the per-row-tile re-stream).
        feat_spec = pl.BlockSpec((tk, feat_pad), lambda i, k: (k, 0))

    in_specs = [
        pl.BlockSpec((tm, tk), lambda i, k: (i, k)),   # adj tile
        feat_spec,                                     # features
    ]
    operands = [adj_bf16, feat_p]

    if aggregate_first:
        w_p = jnp.zeros((feat_pad, out_pad), jnp.bfloat16).at[:f_in, :f_out].set(
            weight.astype(jnp.bfloat16))
        in_specs.append(pl.BlockSpec((feat_pad, out_pad), lambda i, k: (0, 0)))
        operands.append(w_p)

    kernel = _make_gcn_kernel(
        resident_feat=resident_feat, apply_w=aggregate_first, tk=tk)

    out_padded = pl.pallas_call(
        kernel,
        out_shape=jax.ShapeDtypeStruct((n_rows_pad, out_cols), jnp.float32),
        grid=grid,
        in_specs=in_specs,
        out_specs=pl.BlockSpec((tm, out_cols), lambda i, k: (i, 0)),
        scratch_shapes=[pltpu.VMEM((tm, feat_pad), jnp.float32)],
        compiler_params=compiler_params,
    )(*operands)

    return out_padded[:num_nodes, :f_out]


# ------------------------------- reference ------------------------------------

def _reference(x, edge_index, weight):
    num_nodes = x.shape[0]
    loop = jnp.arange(num_nodes, dtype=edge_index.dtype)
    ei = jnp.concatenate([edge_index, jnp.stack([loop, loop])], axis=1)
    row, col = ei[0], ei[1]
    deg = jnp.zeros((num_nodes,), jnp.float32).at[row].add(1.0)
    dis = jnp.where(deg > 0, deg ** -0.5, 0.0)
    norm = dis[row] * dis[col]
    adj = jnp.zeros((num_nodes, num_nodes), jnp.float32).at[row, col].add(norm)
    return adj @ x @ weight


if __name__ == "__main__":
    keys = jax.random.split(jax.random.PRNGKey(0), 6)

    # -- test 1: module-sized shapes (F_in < F_out -> aggregate-first, resident feat) --
    n1, fi1, fo1, e1 = 16, 8, 32, 24
    x1 = jax.random.normal(keys[0], (n1, fi1), dtype=jnp.float32)
    w1 = jax.random.normal(keys[1], (fi1, fo1), dtype=jnp.float32)
    ei1 = jax.random.randint(keys[2], (2, e1), 0, n1, dtype=jnp.int32)

    out1 = jax.block_until_ready(gcn_layer_forward(x1, ei1, w1))
    ref1 = _reference(x1, ei1, w1)
    assert out1.shape == ref1.shape
    assert jnp.allclose(out1, ref1, atol=1e-1, rtol=5e-2), "test-1 mismatch vs reference"

    # -- test 2: multi row-tile grid + padding + transform-first path (F_out < F_in) --
    n2, fi2, fo2, e2 = 300, 32, 8, 900
    x2 = jax.random.normal(keys[3], (n2, fi2), dtype=jnp.float32)
    w2 = jax.random.normal(keys[4], (fi2, fo2), dtype=jnp.float32)
    ei2 = jax.random.randint(keys[5], (2, e2), 0, n2, dtype=jnp.int32)

    out2 = jax.block_until_ready(gcn_layer_forward(x2, ei2, w2))
    ref2 = _reference(x2, ei2, w2)
    assert out2.shape == ref2.shape
    assert jnp.allclose(out2, ref2, atol=1e-1, rtol=5e-2), "test-2 mismatch vs reference"

    # -- test 3/4: force the streamed-feature fallback path (resident budget = 0) --
    out3 = jax.block_until_ready(
        gcn_layer_forward(x1, ei1, w1, resident_budget_bytes=0))
    assert jnp.allclose(out3, ref1, atol=1e-1, rtol=5e-2), "test-3 mismatch vs reference"

    out4 = jax.block_until_ready(
        gcn_layer_forward(x2, ei2, w2, resident_budget_bytes=0))
    assert jnp.allclose(out4, ref2, atol=1e-1, rtol=5e-2), "test-4 mismatch vs reference"

    print("KERNEL_OK")
</pallas_src>

<mosaic_0001>
module attributes {stable_mosaic.version = 11 : i64} {
  func.func @kernel(%arg0: i32, %arg1: i32, %arg2: memref<128x128xbf16, #tpu.memory_space<vmem>>, %arg3: memref<128x128xbf16, #tpu.memory_space<vmem>>, %arg4: memref<128x128xbf16, #tpu.memory_space<vmem>>, %arg5: memref<128x128xf32, #tpu.memory_space<vmem>>, %arg6: memref<128x128xf32, #tpu.memory_space<vmem>>) attributes {dimension_semantics = [#tpu.dimension_semantics<parallel>, #tpu.dimension_semantics<arbitrary>], iteration_bounds = array<i64: 1, 1>, scalar_prefetch = 0 : i64, scratch_operands = 1 : i64, tpu.core_type = #tpu.core_type<tc>, window_params = [{transform_indices = @transform_0, window_bounds = array<i64: 128, 128>}, {pipeline_mode = #tpu.pipeline_mode<synchronous>, transform_indices = @transform_1, window_bounds = array<i64: 128, 128>}, {pipeline_mode = #tpu.pipeline_mode<synchronous>, transform_indices = @transform_2, window_bounds = array<i64: 128, 128>}, {transform_indices = @transform_3, window_bounds = array<i64: 128, 128>}]} {
    %c0_i32 = arith.constant 0 : i32
    %0 = arith.cmpi eq, %arg1, %c0_i32 : i32
    %1 = arith.extui %0 : i1 to i32
    %c0_i32_0 = arith.constant 0 : i32
    %2 = arith.cmpi ne, %1, %c0_i32_0 : i32
    scf.if %2 {
      %cst_9 = arith.constant 0.000000e+00 : f32
      %15 = vector.broadcast %cst_9 : f32 to vector<128x128xf32>
      %c0_10 = arith.constant 0 : index
      %c0_11 = arith.constant 0 : index
      %16 = vector.load %arg6[%c0_10, %c0_11] : memref<128x128xf32, #tpu.memory_space<vmem>>, vector<128x128xf32>
      tpu.vector_store %arg6[%c0_10, %c0_11], %15 {strides = array<i32>} : memref<128x128xf32, #tpu.memory_space<vmem>>, vector<128x128xf32>,
    } else {
    }
    %c128_i32 = arith.constant 128 : i32
    %3 = arith.muli %arg1, %c128_i32 : i32
    %4 = tpu.assume_multiple %3, 128 : i32
    %5 = arith.index_cast %4 : i32 to index
    %c0 = arith.constant 0 : index
    %6 = vector.load %arg3[%5, %c0] : memref<128x128xbf16, #tpu.memory_space<vmem>>, vector<128x128xbf16>
    %c0_1 = arith.constant 0 : index
    %c0_2 = arith.constant 0 : index
    %7 = vector.load %arg6[%c0_1, %c0_2] : memref<128x128xf32, #tpu.memory_space<vmem>>, vector<128x128xf32>
    %c0_3 = arith.constant 0 : index
    %c0_4 = arith.constant 0 : index
    %8 = vector.load %arg2[%c0_3, %c0_4] : memref<128x128xbf16, #tpu.memory_space<vmem>>, vector<128x128xbf16>
    %cst = arith.constant dense<0.000000e+00> : vector<128x128xf32>
    %9 = tpu.matmul %8, %6, %cst {dimension_numbers = #tpu.dot_dimension_numbers<[1], [0], [0], [1], [0, 0, 1, 1], [], []>} : vector<128x128xbf16>, vector<128x128xbf16>, vector<128x128xf32> -> vector<128x128xf32>
    %10 = arith.addf %7, %9 : vector<128x128xf32>
    %c0_5 = arith.constant 0 : index
    %c0_6 = arith.constant 0 : index
    %11 = vector.load %arg6[%c0_5, %c0_6] : memref<128x128xf32, #tpu.memory_space<vmem>>, vector<128x128xf32>
    tpu.vector_store %arg6[%c0_5, %c0_6], %10 {strides = array<i32>} : memref<128x128xf32, #tpu.memory_space<vmem>>, vector<128x128xf32>,
    %c0_i32_7 = arith.constant 0 : i32
    %12 = arith.cmpi eq, %arg1, %c0_i32_7 : i32
    %13 = arith.extui %12 : i1 to i32
    %c0_i32_8 = arith.constant 0 : i32
    %14 = arith.cmpi ne, %13, %c0_i32_8 : i32
    scf.if %14 {
      %c0_9 = arith.constant 0 : index
      %c0_10 = arith.constant 0 : index
      %15 = vector.load %arg6[%c0_9, %c0_10] : memref<128x128xf32, #tpu.memory_space<vmem>>, vector<128x128xf32>
      %16 = arith.truncf %15 : vector<128x128xf32> to vector<128x128xbf16>
      %c0_11 = arith.constant 0 : index
      %c0_12 = arith.constant 0 : index
      %17 = vector.load %arg4[%c0_11, %c0_12] : memref<128x128xbf16, #tpu.memory_space<vmem>>, vector<128x128xbf16>
      %cst_13 = arith.constant dense<0.000000e+00> : vector<128x128xf32>
      %18 = tpu.matmul %16, %17, %cst_13 {dimension_numbers = #tpu.dot_dimension_numbers<[1], [0], [0], [1], [0, 0, 1, 1], [], []>} : vector<128x128xbf16>, vector<128x128xbf16>, vector<128x128xf32> -> vector<128x128xf32>
      %c0_14 = arith.constant 0 : index
      %c0_15 = arith.constant 0 : index
      %19 = vector.load %arg5[%c0_14, %c0_15] : memref<128x128xf32, #tpu.memory_space<vmem>>, vector<128x128xf32>
      tpu.vector_store %arg5[%c0_14, %c0_15], %18 {strides = array<i32>} : memref<128x128xf32, #tpu.memory_space<vmem>>, vector<128x128xf32>,
    } else {
    }
    return
  }
  func.func @transform_0(%arg0: i32, %arg1: i32) -> (i32, i32) {
    %c0_i32 = arith.constant 0 : i32
    return %arg0, %arg1 : i32, i32
  }
  func.func @transform_1(%arg0: i32, %arg1: i32) -> (i32, i32) {
    %c0_i32 = arith.constant 0 : i32
    %c0_i32_0 = arith.constant 0 : i32
    %c0_i32_1 = arith.constant 0 : i32
    return %c0_i32, %c0_i32_0 : i32, i32
  }
  func.func @transform_2(%arg0: i32, %arg1: i32) -> (i32, i32) {
    %c0_i32 = arith.constant 0 : i32
    %c0_i32_0 = arith.constant 0 : i32
    %c0_i32_1 = arith.constant 0 : i32
    return %c0_i32, %c0_i32_0 : i32, i32
  }
  func.func @transform_3(%arg0: i32, %arg1: i32) -> (i32, i32) {
    %c0_i32 = arith.constant 0 : i32
    %c0_i32_0 = arith.constant 0 : i32
    return %arg0, %c0_i32 : i32, i32
  }
}

</mosaic_0001>

<bundles_post_ra>
// kernel: gcn_layer_forward.1
= control target key start
LH: loop header
LB: loop body
LE: loop exit
PB: predicated region body
PF: predicated region fallthrough
CT: control target
= control target key end

     0   :  { %s807_s1 = inlined_call_operand.vmem [shape: bf16[128,128], index: 1, kind: input, shape index: {}]   ;;  %s808_s0 = inlined_call_operand.vmem [shape: bf16[128,128], index: 0, kind: input, shape index: {}]   ;;  %s809_s2 = inlined_call_operand.vmem [shape: bf16[128,128], index: 2, kind: input, shape index: {}]   ;;  %s810_s3 = inlined_call_operand.vmem [shape: f32[128,128], index: 3, kind: output, shape index: {}]  }
   0x1   :  { %v643_v0 = vld [vmem:[%s807_s1] sm:$0xff]   ;;  %v644_v1 = vld [vmem:[%s807_s1 + $0x8] sm:$0xff]   ;;  %v645_v2 = vld [vmem:[%s807_s1 + $0x10] sm:$0xff]  }
   0x2   :  { %579 = vmatprep.subr.bf16.mxu0 %v643_v0  ;;  %v646_v3 = vld [vmem:[%s807_s1 + $0x18] sm:$0xff]   ;;  %v651_v4 = vld [vmem:[%s808_s0] sm:$0xff]   ;;  %v648_v6 = vld [vmem:[%s807_s1 + $0x28] sm:$0xff]  }
   0x3   :  { %580 = vmatpush3.bf16.msra.mxu0 %v643_v0  ;;  %595 = vmatprep.mubr.bf16.mxu0 %v651_v4  ;;  %v647_v5 = vld [vmem:[%s807_s1 + $0x20] sm:$0xff]   ;;  %v660_v8 = vld [vmem:[%s809_s2 + $0x8] sm:$0xff]   ;;  %v649_v9 = vld [vmem:[%s807_s1 + $0x30] sm:$0xff]  }
   0x4   :  { %581 = vmatprep.subr.bf16.mxu0 %v644_v1  ;;  %v659_v7 = vld [vmem:[%s809_s2] sm:$0xff]   ;;  %v661_v10 = vld [vmem:[%s809_s2 + $0x10] sm:$0xff]   ;;  %v650_v11 = vld [vmem:[%s807_s1 + $0x38] sm:$0xff]  }
   0x5   :  { %611 = vmatprep.subr.bf16.mxu1 %v659_v7  ;;  %v662_v12 = vld [vmem:[%s809_s2 + $0x18] sm:$0xff]   ;;  %v663_v13 = vld [vmem:[%s809_s2 + $0x20] sm:$0xff]   ;;  %v652_v14 = vld [vmem:[%s808_s0 + $0x8] sm:$0xff]  }
   0x6   :  { %612 = vmatpush3.bf16.msra.mxu1 %v659_v7  ;;  %v653_v15 = vld [vmem:[%s808_s0 + $0x10] sm:$0xff]   ;;  %v664_v16 = vld [vmem:[%s809_s2 + $0x28] sm:$0xff]   ;;  %v654_v18 = vld [vmem:[%s808_s0 + $0x18] sm:$0xff]  }
   0x7   :  { %582 = vmatpush3.bf16.msra.mxu0 %v644_v1  ;;  %613 = vmatprep.subr.bf16.mxu1 %v660_v8  ;;  %v665_v17 = vld [vmem:[%s809_s2 + $0x30] sm:$0xff]   ;;  %v655_v19 = vld [vmem:[%s808_s0 + $0x20] sm:$0xff]   ;;  %v656_v20 = vld [vmem:[%s808_s0 + $0x28] sm:$0xff]  }
   0x8   :  { %583 = vmatprep.subr.bf16.mxu0 %v645_v2  ;;  %v657_v21 = vld [vmem:[%s808_s0 + $0x30] sm:$0xff]   ;;  %v658_v22 = vld [vmem:[%s808_s0 + $0x38] sm:$0xff]  }
   0x9   :  { %v666_v23 = vld [vmem:[%s809_s2 + $0x38] sm:$0xff]  }
   0xa   :  { %614 = vmatpush3.bf16.msra.mxu1 %v660_v8 }
   0xb   :  { %584 = vmatpush3.bf16.msra.mxu0 %v645_v2  ;;  %615 = vmatprep.subr.bf16.mxu1 %v661_v10 }
   0xc   :  { %585 = vmatprep.subr.bf16.mxu0 %v646_v3 }
   0xe   :  { %616 = vmatpush3.bf16.msra.mxu1 %v661_v10 }
   0xf   :  { %586 = vmatpush3.bf16.msra.mxu0 %v646_v3  ;;  %617 = vmatprep.subr.bf16.mxu1 %v662_v12 }
  0x10   :  { %587 = vmatprep.subr.bf16.mxu0 %v647_v5 }
  0x12   :  { %618 = vmatpush3.bf16.msra.mxu1 %v662_v12 }
  0x13   :  { %588 = vmatpush3.bf16.msra.mxu0 %v647_v5  ;;  %619 = vmatprep.subr.bf16.mxu1 %v663_v13 }
  0x14   :  { %589 = vmatprep.subr.bf16.mxu0 %v648_v6 }
  0x16   :  { %620 = vmatpush3.bf16.msra.mxu1 %v663_v13 }
  0x17   :  { %590 = vmatpush3.bf16.msra.mxu0 %v648_v6  ;;  %621 = vmatprep.subr.bf16.mxu1 %v664_v16 }
  0x18   :  { %591 = vmatprep.subr.bf16.mxu0 %v649_v9 }
  0x1a   :  { %622 = vmatpush3.bf16.msra.mxu1 %v664_v16 }
  0x1b   :  { %592 = vmatpush3.bf16.msra.mxu0 %v649_v9  ;;  %623 = vmatprep.subr.bf16.mxu1 %v665_v17 }
  0x1c   :  { %593 = vmatprep.subr.bf16.mxu0 %v650_v11 }
  0x1e   :  { %624 = vmatpush3.bf16.msra.mxu1 %v665_v17 }
  0x1f   :  { %594 = vmatpush3.bf16.msra.mxu0 %v650_v11  ;;  %625 = vmatprep.subr.bf16.mxu1 %v666_v23 }
  0x22   :  { %596 = vmatmul.mubr.bf16.vlgmr.msra.gmra.mrb[0].mxu0 %v652_v14  ;;  %626 = vmatpush3.bf16.msra.mxu1 %v666_v23 }
  0x23   :  { %599 = vmatprep.mubr.bf16.mxu0 %v653_v15 }
  0x2a   :  { %600 = vmatmul.mubr.bf16.gmra.mrb[4].mxu0 %v654_v18 }
  0x2b   :  { %603 = vmatprep.mubr.bf16.mxu0 %v655_v19 }
  0x32   :  { %604 = vmatmul.mubr.bf16.gmra.mrb[8].mxu0 %v656_v20 }
  0x33   :  { %607 = vmatprep.mubr.bf16.mxu0 %v657_v21 }
  0x3a   :  { %608 = vmatmul.mubr.bf16.gmra.mrb[12].mxu0 %v658_v22 }
  0xf5   :  { %v597_v24 = vpop.f32.mrb[0].mxu0 }
  0xf6   :  { %v218_v25 = vpop.f32.mrb[1].mxu0 }
  0xf7   :  { %v598_v26 = vpop.f32.mrb[2].mxu0 }
  0xf8   :  { %v333_v27 = vpack.c.bf16 %v598_v26, %v597_v24  ;;  %v221_v28 = vpop.f32.mrb[3].mxu0 }
  0xf9   :  { %v332_v29 = vpack.c.bf16 %v221_v28, %v218_v25 }
  0xfb   :  { %627 = vmatprep.mubr.bf16.mxu1 %v332_v29 }
  0xfc   :  { %628 = vmatmul.mubr.bf16.vlgmr.msra.gmra.mrb[0].mxu1 %v333_v27 }
  0xfd   :  { %v601_v30 = vpop.f32.mrb[4].mxu0 }
  0xfe   :  { %v234_v31 = vpop.f32.mrb[5].mxu0 }
  0xff   :  { %v602_v32 = vpop.f32.mrb[6].mxu0 }
 0x100   :  { %v335_v33 = vpack.c.bf16 %v602_v32, %v601_v30  ;;  %v237_v34 = vpop.f32.mrb[7].mxu0 }
 0x101   :  { %v334_v35 = vpack.c.bf16 %v237_v34, %v234_v31 }
 0x103   :  { %631 = vmatprep.mubr.bf16.mxu1 %v334_v35 }
 0x104   :  { %632 = vmatmul.mubr.bf16.gmra.mrb[4].mxu1 %v335_v33 }
 0x105   :  { %v605_v36 = vpop.f32.mrb[8].mxu0 }
 0x106   :  { %v250_v37 = vpop.f32.mrb[9].mxu0 }
 0x107   :  { %v606_v38 = vpop.f32.mrb[10].mxu0 }
 0x108   :  { %v337_v39 = vpack.c.bf16 %v606_v38, %v605_v36  ;;  %v253_v40 = vpop.f32.mrb[11].mxu0 }
 0x109   :  { %v336_v41 = vpack.c.bf16 %v253_v40, %v250_v37 }
 0x10b   :  { %635 = vmatprep.mubr.bf16.mxu1 %v336_v41 }
 0x10c   :  { %636 = vmatmul.mubr.bf16.gmra.mrb[8].mxu1 %v337_v39 }
 0x10d   :  { %v609_v42 = vpop.f32.mrb[12].mxu0 }
 0x10e   :  { %v266_v43 = vpop.f32.mrb[13].mxu0 }
 0x10f   :  { %v610_v44 = vpop.f32.mrb[14].mxu0 }
 0x110   :  { %v339_v45 = vpack.c.bf16 %v610_v44, %v609_v42  ;;  %v269_v46 = vpop.f32.mrb[15].mxu0 }
 0x111   :  { %v338_v47 = vpack.c.bf16 %v269_v46, %v266_v43 }
 0x113   :  { %639 = vmatprep.mubr.bf16.mxu1 %v338_v47 }
 0x114   :  { %640 = vmatmul.mubr.bf16.gmra.mrb[12].mxu1 %v339_v45 }
 0x1cf   :  { %v629_v48 = vpop.f32.mrb[0].mxu1 }
 0x1d0   :  { %503 = vst [vmem:[%s810_s3 + $0x10] sm:$0xff] %v629_v48  ;;  %v438_v49 = vpop.f32.mrb[1].mxu1 }
 0x1d1   :  { %501 = vst [vmem:[%s810_s3] sm:$0xff] %v438_v49  ;;  %v630_v50 = vpop.f32.mrb[2].mxu1 }
 0x1d2   :  { %504 = vst [vmem:[%s810_s3 + $0x18] sm:$0xff] %v630_v50  ;;  %v441_v51 = vpop.f32.mrb[3].mxu1 }
 0x1d3   :  { %502 = vst [vmem:[%s810_s3 + $0x8] sm:$0xff] %v441_v51 }
 0x1d7   :  { %v633_v52 = vpop.f32.mrb[4].mxu1 }
 0x1d8   :  { %507 = vst [vmem:[%s810_s3 + $0x30] sm:$0xff] %v633_v52  ;;  %v454_v53 = vpop.f32.mrb[5].mxu1 }
 0x1d9   :  { %505 = vst [vmem:[%s810_s3 + $0x20] sm:$0xff] %v454_v53  ;;  %v634_v54 = vpop.f32.mrb[6].mxu1 }
 0x1da   :  { %508 = vst [vmem:[%s810_s3 + $0x38] sm:$0xff] %v634_v54  ;;  %v457_v55 = vpop.f32.mrb[7].mxu1 }
 0x1db   :  { %506 = vst [vmem:[%s810_s3 + $0x28] sm:$0xff] %v457_v55 }
 0x1df   :  { %v637_v56 = vpop.f32.mrb[8].mxu1 }
 0x1e0   :  { %511 = vst [vmem:[%s810_s3 + $0x50] sm:$0xff] %v637_v56  ;;  %v470_v57 = vpop.f32.mrb[9].mxu1 }
 0x1e1   :  { %509 = vst [vmem:[%s810_s3 + $0x40] sm:$0xff] %v470_v57  ;;  %v638_v58 = vpop.f32.mrb[10].mxu1 }
 0x1e2   :  { %512 = vst [vmem:[%s810_s3 + $0x58] sm:$0xff] %v638_v58  ;;  %v473_v59 = vpop.f32.mrb[11].mxu1 }
 0x1e3   :  { %510 = vst [vmem:[%s810_s3 + $0x48] sm:$0xff] %v473_v59 }
 0x1e7   :  { %v641_v60 = vpop.f32.mrb[12].mxu1 }
 0x1e8   :  { %515 = vst [vmem:[%s810_s3 + $0x70] sm:$0xff] %v641_v60  ;;  %v486_v61 = vpop.f32.mrb[13].mxu1 }
 0x1e9   :  { %513 = vst [vmem:[%s810_s3 + $0x60] sm:$0xff] %v486_v61  ;;  %v642_v62 = vpop.f32.mrb[14].mxu1 }
 0x1ea   :  { %516 = vst [vmem:[%s810_s3 + $0x78] sm:$0xff] %v642_v62  ;;  %v489_v63 = vpop.f32.mrb[15].mxu1 }
 0x1eb   :  { %514 = vst [vmem:[%s810_s3 + $0x68] sm:$0xff] %v489_v63 }

</bundles_post_ra>
